<compile_context>
chip_gen: v6e
topology: v6e:2x2x1
jax: 0.10.0
libtpu: 0.0.40
codegen_flags: <defaults>
</compile_context>

<pallas_src>
import functools

import jax
import jax.numpy as jnp
from jax.experimental import pallas as pl
from jax.experimental.pallas import tpu as pltpu


def _box_filter_kernel(x_ref, bw_ref, bh_ref, o_ref, *, inv_area):
    tc, H, W = x_ref.shape
    band_dtype = bw_ref.dtype

    # Horizontal pass: fold (TC, H) into the MXU M dim -> (TC*H, W) @ (W, W).
    xm = x_ref[...].reshape(tc * H, W)
    tmp = jnp.dot(xm, bw_ref[...], preferred_element_type=jnp.float32)   # (TC*H, W) f32

    # Vertical pass on the transposed slab: (TC*W, H) @ (H, H); Bh is symmetric so
    # no explicit transpose of Bh is needed.
    tmp = tmp.reshape(tc, H, W).transpose(0, 2, 1).reshape(tc * W, H)
    tmp = tmp.astype(band_dtype)
    out = jnp.dot(tmp, bh_ref[...], preferred_element_type=jnp.float32)  # (TC*W, H) f32
    out = out.reshape(tc, W, H).transpose(0, 2, 1)                       # (TC, H, W)

    # Single f32 scale by 1/k^2, then one cast to the output dtype.
    o_ref[...] = (out * inv_area).astype(o_ref.dtype)


def _band_matrix(n, r, dtype):
    """0/1 banded matrix: band[i, j] = 1 if |i - j| <= r else 0 (exact in any float dtype)."""
    idx = jnp.arange(n)
    return (jnp.abs(idx[:, None] - idx[None, :]) <= r).astype(dtype)


def _pick_channel_block(nc, h, w, itemsize):
    """Largest divisor of nc that fits a ~8 MiB slab budget and keeps the grid >= 2 steps."""
    budget = 8 * 1024 * 1024
    per_chan = h * w * max(itemsize, 4)          # f32 intermediates dominate
    cap = max(1, budget // (6 * per_chan))
    best = 1
    for tc in range(1, nc + 1):
        if nc % tc == 0 and tc <= cap and (nc // tc) >= 2:
            best = tc
    return best


def box_filter(x, r):
    """x: (N, C, H, W) array. Returns same shape, same dtype (PyTorch BoxFilter.forward)."""
    N, C, H, W = x.shape
    dtype = x.dtype
    NC = N * C
    k = 2 * r + 1
    inv_area = 1.0 / float(k * k)

    # 0/1 band matrices: bf16 for bf16 inputs (native MXU path), else f32 (exact).
    band_dtype = jnp.bfloat16 if dtype == jnp.bfloat16 else jnp.float32
    bw = _band_matrix(W, r, band_dtype)   # (W, W): right-multiply -> horizontal sums
    bh = _band_matrix(H, r, band_dtype)   # (H, H): symmetric   -> vertical sums

    xf = x.reshape(NC, H, W)
    tc = _pick_channel_block(NC, H, W, jnp.dtype(dtype).itemsize)
    grid = (NC // tc,)

    # VMEM budget: double-buffered in/out slabs + band matrices + f32 temps, 2x headroom,
    # capped at v7x's 64 MiB physical VMEM.
    # TODO(synk): for very large H/W the full (H,H)/(W,W) band matrices exceed VMEM;
    # banded K-tiling (or a roll-based sliding-window sum) would be needed there.
    # TODO(synk): for tiny W the output stores are lane-masked (W < 128); fully lane-dense
    # output would require packing channels along the lane axis (layout change outside scope).
    block_bytes = tc * H * W * jnp.dtype(dtype).itemsize
    band_bytes = (H * H + W * W) * jnp.dtype(band_dtype).itemsize
    temp_bytes = 4 * tc * H * W * 4
    vmem_limit = int(min(64 * 1024 * 1024,
                         max(16 * 1024 * 1024,
                             2 * (4 * block_bytes + 2 * band_bytes + temp_bytes))))

    out = pl.pallas_call(
        functools.partial(_box_filter_kernel, inv_area=inv_area),
        out_shape=jax.ShapeDtypeStruct((NC, H, W), dtype),
        grid_spec=pltpu.PrefetchScalarGridSpec(
            num_scalar_prefetch=0,
            grid=grid,
            in_specs=[
                pl.BlockSpec((tc, H, W), lambda i: (i, 0, 0)),
                # Grid-invariant constants (could also be single-buffered via
                # pipeline_mode=pl.Buffered(1); left at the default for portability).
                pl.BlockSpec((W, W), lambda i: (0, 0)),
                pl.BlockSpec((H, H), lambda i: (0, 0)),
            ],
            out_specs=pl.BlockSpec((tc, H, W), lambda i: (i, 0, 0)),
        ),
        compiler_params=pltpu.CompilerParams(
            dimension_semantics=("parallel",),
            vmem_limit_bytes=vmem_limit,
        ),
    )(xf, bw, bh)

    return out.reshape(N, C, H, W)


def _reference_box_filter(x, r):
    """Pure-JAX reference matching F.conv2d semantics (zero padding, divide by k)."""
    k = 2 * r + 1
    N, C, H, W = x.shape
    xp = jnp.pad(x, ((0, 0), (0, 0), (0, 0), (r, r)))
    hx = sum(xp[:, :, :, d:d + W] for d in range(k)) / k
    hp = jnp.pad(hx, ((0, 0), (0, 0), (r, r), (0, 0)))
    return sum(hp[:, :, d:d + H, :] for d in range(k)) / k


if __name__ == "__main__":
    key = jax.random.PRNGKey(0)
    N, C, H, W = 2, 4, 16, 16
    r = 2
    x = jax.random.normal(key, (N, C, H, W), dtype=jnp.float32)

    out = box_filter(x, r)
    out = jax.block_until_ready(out)

    ref = _reference_box_filter(x, r)
    assert out.shape == (N, C, H, W)
    assert out.dtype == x.dtype
    assert jnp.allclose(out, ref, atol=1e-5, rtol=1e-5)
    print("KERNEL_OK")
</pallas_src>

<mosaic_0001>
module attributes {stable_mosaic.version = 11 : i64} {
  func.func @_box_filter_kernel(%arg0: i32, %arg1: memref<4x16x16xf32, #tpu.memory_space<vmem>>, %arg2: memref<16x16xf32, #tpu.memory_space<vmem>>, %arg3: memref<16x16xf32, #tpu.memory_space<vmem>>, %arg4: memref<4x16x16xf32, #tpu.memory_space<vmem>>) attributes {dimension_semantics = [#tpu.dimension_semantics<parallel>], iteration_bounds = array<i64: 2>, scalar_prefetch = 0 : i64, scratch_operands = 0 : i64, tpu.core_type = #tpu.core_type<tc>, window_params = [{transform_indices = @transform_0, window_bounds = array<i64: 4, 16, 16>}, {pipeline_mode = #tpu.pipeline_mode<synchronous>, transform_indices = @transform_1, window_bounds = array<i64: 16, 16>}, {pipeline_mode = #tpu.pipeline_mode<synchronous>, transform_indices = @transform_2, window_bounds = array<i64: 16, 16>}, {transform_indices = @transform_3, window_bounds = array<i64: 4, 16, 16>}]} {
    %c0 = arith.constant 0 : index
    %c0_0 = arith.constant 0 : index
    %c0_1 = arith.constant 0 : index
    %0 = vector.load %arg1[%c0, %c0_0, %c0_1] : memref<4x16x16xf32, #tpu.memory_space<vmem>>, vector<4x16x16xf32>
    %1 = vector.shape_cast %0 : vector<4x16x16xf32> to vector<64x16xf32>
    %c0_2 = arith.constant 0 : index
    %c0_3 = arith.constant 0 : index
    %2 = vector.load %arg2[%c0_2, %c0_3] : memref<16x16xf32, #tpu.memory_space<vmem>>, vector<16x16xf32>
    %cst = arith.constant dense<0.000000e+00> : vector<64x16xf32>
    %3 = tpu.matmul %1, %2, %cst {dimension_numbers = #tpu.dot_dimension_numbers<[1], [0], [0], [1], [0, 0, 1, 1], [], []>} : vector<64x16xf32>, vector<16x16xf32>, vector<64x16xf32> -> vector<64x16xf32>
    %4 = vector.shape_cast %3 : vector<64x16xf32> to vector<4x16x16xf32>
    %5 = tpu.transpose %4, [0, 2, 1] : vector<4x16x16xf32> -> vector<4x16x16xf32>
    %6 = vector.shape_cast %5 : vector<4x16x16xf32> to vector<64x16xf32>
    %c0_4 = arith.constant 0 : index
    %c0_5 = arith.constant 0 : index
    %7 = vector.load %arg3[%c0_4, %c0_5] : memref<16x16xf32, #tpu.memory_space<vmem>>, vector<16x16xf32>
    %cst_6 = arith.constant dense<0.000000e+00> : vector<64x16xf32>
    %8 = tpu.matmul %6, %7, %cst_6 {dimension_numbers = #tpu.dot_dimension_numbers<[1], [0], [0], [1], [0, 0, 1, 1], [], []>} : vector<64x16xf32>, vector<16x16xf32>, vector<64x16xf32> -> vector<64x16xf32>
    %9 = vector.shape_cast %8 : vector<64x16xf32> to vector<4x16x16xf32>
    %10 = tpu.transpose %9, [0, 2, 1] : vector<4x16x16xf32> -> vector<4x16x16xf32>
    %cst_7 = arith.constant 4.000000e-02 : f32
    %11 = vector.broadcast %cst_7 : f32 to vector<4x16x16xf32>
    %12 = arith.mulf %10, %11 : vector<4x16x16xf32>
    %c0_8 = arith.constant 0 : index
    %c0_9 = arith.constant 0 : index
    %c0_10 = arith.constant 0 : index
    %13 = vector.load %arg4[%c0_8, %c0_9, %c0_10] : memref<4x16x16xf32, #tpu.memory_space<vmem>>, vector<4x16x16xf32>
    tpu.vector_store %arg4[%c0_8, %c0_9, %c0_10], %12 {strides = array<i32>} : memref<4x16x16xf32, #tpu.memory_space<vmem>>, vector<4x16x16xf32>,
    return
  }
  func.func @transform_0(%arg0: i32) -> (i32, i32, i32) {
    %c0_i32 = arith.constant 0 : i32
    %c0_i32_0 = arith.constant 0 : i32
    %c0_i32_1 = arith.constant 0 : i32
    return %arg0, %c0_i32, %c0_i32_0 : i32, i32, i32
  }
  func.func @transform_1(%arg0: i32) -> (i32, i32) {
    %c0_i32 = arith.constant 0 : i32
    %c0_i32_0 = arith.constant 0 : i32
    %c0_i32_1 = arith.constant 0 : i32
    return %c0_i32, %c0_i32_0 : i32, i32
  }
  func.func @transform_2(%arg0: i32) -> (i32, i32) {
    %c0_i32 = arith.constant 0 : i32
    %c0_i32_0 = arith.constant 0 : i32
    %c0_i32_1 = arith.constant 0 : i32
    return %c0_i32, %c0_i32_0 : i32, i32
  }
  func.func @transform_3(%arg0: i32) -> (i32, i32, i32) {
    %c0_i32 = arith.constant 0 : i32
    %c0_i32_0 = arith.constant 0 : i32
    %c0_i32_1 = arith.constant 0 : i32
    return %arg0, %c0_i32, %c0_i32_0 : i32, i32, i32
  }
}

</mosaic_0001>

<bundles_post_ra>
// kernel: tpu_custom_call.1
= control target key start
LH: loop header
LB: loop body
LE: loop exit
PB: predicated region body
PF: predicated region fallthrough
CT: control target
= control target key end

     0   :  { %8 = vsyncpa [#allocation3], 0  ;;  %s1438_s0 = inlined_call_operand.hbm [shape: f32[8,16,16], index: 0, kind: input, shape index: {}]   ;;  %s1439_s1 = inlined_call_operand.hbm [shape: f32[16,16], index: 1, kind: input, shape index: {}]   ;;  %s1440_s2 = inlined_call_operand.hbm [shape: f32[16,16], index: 2, kind: input, shape index: {}]   ;;  %s1441_s3 = inlined_call_operand.hbm [shape: f32[8,16,16], index: 3, kind: output, shape index: {}]  }
   0x1   :  { %10 = vsyncpa [#allocation3 + $0x1], 0 }
   0x2   :  { %11 = vsyncpa [#allocation6], 0 }
   0x3   :  { %12 = vsyncpa [#allocation4], 0 }
   0x4   :  { %14 = vsyncpa [#allocation4 + $0x1], 0  ;;  %s1213_s12 = smov 0   ;;  %s1215_s13 = smov 0  }
   0x5   :  { %s1217_s14 = smov 0   ;;  %s1219_s15 = smov 0  }
   0x6 LB: > { %s1234_s16 = sadd.s32 4294967295, %s1183_s15   ;;  %s871_s17 = sadd.s32 4294967294, %s1183_s15   ;;  %s1183_s15 = sphi %s1219_s15, %s1462_s15   ;;  %s1179_s14 = sphi %s1217_s14, %s1461_s14   ;;  %s1175_s13 = sphi %s1215_s13, %s1460_s13   ;;  %s1171_s12 = sphi %s1213_s12, %s1459_s12  }
   0x7   : > { %p40_p0 = scmp.ne.s32.totalorder %s1175_s13, %s1171_s12  ;;  %p1442_p1 = scmp.eq.s32.totalorder %s1234_s16, 0 }
   0x8   : > { %p106_p2 = scmp.eq.s32.totalorder %s1234_s16, 1  ;;  %p112_p3 = scmp.eq.s32.totalorder %s871_s17, 1 }
   0x9   : > { %p1243_p4 = por %p1442_p1, %p40_p0  ;;  %p872_p5 = scmp.ge.s32.totalorder %s1183_s15, 1 }
   0xa   : > { %p1248_p6 = por %p112_p3, %p40_p0  ;;  %p119_p7 = scmp.lt.s32.totalorder %s1183_s15, 3 }
   0xb   : > { %s1446_s18 = scalar_select %p1243_p4, 1, 0 }
   0xc   : > { %s1447_s19 = scalar_select %p1248_p6, 1, 0 }
   0xd   : > { %p1253_p8 = pnand %p872_p5, %p119_p7  ;;  %s1185_s21 = smov [#allocation5]  }
   0xe   : > { %s131_s22 = sshll.u32 %s1185_s21, 4  ;;  %s1186_s24 = smov [#allocation7]   ;;  %s132_s22 = int_to_ptr.vmem [resolvable:$true] %s131_s22 }
   0xf   : > { %s1448_s20 = scalar_select %p1253_p8, 1, 0 }
  0x10   : > { %p975_p9 = pneg %p1253_p8  ;;  %s144_s25 = sshll.u32 %s1186_s24, 4  ;;  %s145_s25 = int_to_ptr.vmem [resolvable:$true] %s144_s25 }
  0x11   : > { %s1046_s26 = scalar_lea.vmem %s132_s22, 256  ;;  %p1054_p5 = scmp.lt.s32.totalorder %s132_s22, %s132_s22 }
  0x12   : > { %p1262_p11 = pnand %p975_p9, %p1442_p1  ;;  %p1047_p13 = scmp.ne.s32.totalorder %s132_s22, %s1046_s26 }
  0x13   : > { %p1055_p7 = scmp.lt.s32.totalorder %s1046_s26, %s1046_s26 }
  0x14   : > { %p1037_p12 = pneg %p1262_p11 }
  0x15   : > { %p1056_p10 = por %p1055_p7, %p1054_p5 }
  0x16   : > { %p1049_p0 = pnand %p1047_p13, %p1037_p12 }
  0x18   : > { %p1050_p3 = pneg %p1049_p0 }
  0x1a   : > { %p1057_p9 = pnand %p1056_p10, %p1050_p3 }
  0x1c   : > { %1060 = shalt.err (!%p1057_p9)
}
  0x1d   : > { %s1187_s27 = smov 128   ;;  %s1188_s28 = smov 8  }
  0x1e   : > { %978 = dma.hbm_to_vmem [thread:$0]  (!%p1262_p11), %s1439_s1, 256, %s132_s22, [#allocation6], %s1187_s27, %s1187_s27, %s1188_s28  }
  0x1f   : > { %s1072_s4 = scalar_lea.vmem %s145_s25, 256  ;;  %p1080_p10 = scmp.lt.s32.totalorder %s145_s25, %s145_s25 }
  0x20   : > { %p1073_p13 = scmp.ne.s32.totalorder %s145_s25, %s1072_s4  ;;  %p1081_p3 = scmp.lt.s32.totalorder %s1072_s4, %s1072_s4 }
  0x22   : > { %p1075_p0 = pnand %p1073_p13, %p1037_p12  ;;  %p1082_p7 = por %p1081_p3, %p1080_p10 }
  0x24   : > { %p1076_p5 = pneg %p1075_p0 }
  0x26   : > { %p1083_p9 = pnand %p1082_p7, %p1076_p5 }
  0x28   : > { %1086 = shalt.err (!%p1083_p9)
}
  0x29   : > { %981 = dma.hbm_to_vmem [thread:$0]  (!%p1262_p11), %s1440_s2, 256, %s145_s25, [#allocation6], %s1187_s27, %s1187_s27, %s1188_s28  }
  0x2a   : > { %s1291_s7 = sadd.s32 1, %s1183_s15   ;;  %s27_s8 = sadd.s32 1, %s1179_s14 }
  0x2b   : > { %s24_s9 = ssub.s32 %s1183_s15, %s1291_s7  ;;  %p34_p12 = scmp.ne.s32.totalorder %s1179_s14, %s1175_s13 }
  0x2c   : > { %p25_p13 = scmp.eq.s32.totalorder %s24_s9, 0  ;;  %p35_p0 = scmp.eq.s32.totalorder %s1183_s15, 0 }
  0x2d   : > { %p1301_p5 = por %p106_p2, %p34_p12  ;;  %p992_p10 = scmp.lt.s32.totalorder %s1183_s15, 2 }
  0x2e   : > { %s1307_s11 = scalar_select %p25_p13, %s1179_s14, %s27_s8  }
  0x2f   : > { %s1450_s10 = scalar_select %p1301_p5, 1, 0 }
  0x30   : > { %p36_p3 = por %p35_p0, %p34_p12  ;;  %s158_s17 = sand.u32 1, %s1179_s14  }
  0x31   : > { %s876_s21 = sshll.u32 %s158_s17, 6  ;;  %s908_s22 = sshll.u32 %s1183_s15, 10 }
  0x32   : > { %s1314_s25 = scalar_lea.hbm %s1438_s0, %s908_s22  ;;  %s162_s26 = scalar_lea.vmem [#allocation2], %s876_s21 }
  0x33   : > { %s170_s29 = sshll.u32 %s162_s26, 4  ;;  %p1318_p2 = pnand %p992_p10, %p36_p3  ;;  %s1316_s29 = int_to_ptr.vmem [resolvable:$true] %s170_s29 }
  0x34   : > { %s1322_s4 = scalar_lea.sflag [#allocation3], %s158_s17  ;;  %s1087_s5 = scalar_lea.hbm %s1314_s25, 1024 }
  0x35   : > { %p1088_p11 = scmp.ne.s32.totalorder %s1314_s25, %s1087_s5  ;;  %p1089_p7 = pneg %p1318_p2 }
  0x36   : > { %s1092_s9 = scalar_lea.hbm %s1438_s0, 2048  ;;  %p1093_p13 = scmp.lt.s32.totalorder %s1314_s25, %s1438_s0 }
  0x37   : > { %p1090_p9 = pnand %p1089_p7, %p1088_p11  ;;  %p1094_p0 = scmp.lt.s32.totalorder %s1092_s9, %s1087_s5 }
  0x39   : > { %p1091_p12 = pneg %p1090_p9  ;;  %p1095_p10 = por %p1094_p0, %p1093_p13 }
  0x3b   : > { %p1096_p3 = pnand %p1095_p10, %p1091_p12 }
  0x3d   : > { %1099 = shalt.err (!%p1096_p3)
}
  0x3e   : > { %s1100_s17 = scalar_lea.vmem %s1316_s29, 1024  ;;  %s1189_s23 = smov [#allocation2]  }
  0x3f   : > { %p1101_p1 = scmp.ne.s32.totalorder %s1316_s29, %s1100_s17  ;;  %s1105_s24 = sshll.u32 %s1189_s23, 4  ;;  %s1106_s24 = int_to_ptr.vmem [resolvable:$false] %s1105_s24 }
  0x40   : > { %s1107_s26 = scalar_lea.vmem %s1106_s24, 2048  ;;  %p1108_p9 = scmp.lt.s32.totalorder %s1316_s29, %s1106_s24 }
  0x41   : > { %p1103_p6 = pnand %p1101_p1, %p1089_p7  ;;  %p1109_p5 = scmp.lt.s32.totalorder %s1107_s26, %s1100_s17 }
  0x43   : > { %p1104_p11 = pneg %p1103_p6  ;;  %p1110_p4 = por %p1109_p5, %p1108_p9 }
  0x45   : > { %p1111_p8 = pnand %p1110_p4, %p1104_p11 }
  0x47   : > { %1114 = shalt.err (!%p1111_p8)
}
  0x48   : > { %985 = dma.hbm_to_vmem [thread:$0]  (!%p1318_p2), %s1314_s25, 1024, %s1316_s29, %s1322_s4, %s1187_s27, %s1187_s27, %s1188_s28  }
  0x49   : > { %p1452_p1 = scmp.ne.s32.totalorder %s1448_s20, 0 }
  0x4a   : > { %s1349_s5 = sand.u32 (!%p1452_p1), 1, %s1175_s13   ;;  %p1453_p4 = scmp.ne.s32.totalorder (!%p1452_p1), %s1446_s18, 0 }
  0x4b   : > { %182 = sbr.rel (%p1452_p1) target bundleno = 765 (0x2fd), region = 32  ;;  %s881_s6 = sshll.u32 (!%p1452_p1), %s1349_s5, 6 }
  0x4c   : > { %s185_s8 = scalar_lea.sflag (!%p1452_p1), [#allocation3], %s1349_s5  ;;  %s188_s30 = scalar_lea.vmem (!%p1452_p1), [#allocation2], %s881_s6 }
  0x50   : > { %1158 = dma.done.wait (%p1453_p4), %s185_s8, 1024  }
  0x51   : > { %1160 = vsyncadd (%p1453_p4), %s185_s8, 4294966272  ;;  %p1454_p6 = scmp.eq.s32.totalorder %s1234_s16, 0 }
  0x53   : > { %1162 = dma.done.wait (%p1454_p6), [#allocation6], 512   ;;  %p1455_p8 = pmov %p1454_p6 }
  0x54   : > { %vm231_vm0 = vcmask 130048   ;;  %v230_v0 = vld [vmem:[#allocation5 + $0x8] sm:$0xff]  ;;  %v229_v1 = vld [vmem:[#allocation5] sm:$0xff]  ;;  %v223_v4 = vld [vmem:[%s188_s30 + $0x10] sm:$0xff]  ;;  %s218_s18 = scalar_lea.vmem [#allocation8], %s881_s6  ;;  %s910_s20 = sshll.u32 %s1234_s16, 10 }
  0x55   : > { %1164 = vsyncadd (%p1455_p8), [#allocation6], 4294966784  ;;  %v221_v2 = vld [vmem:[%s188_s30] sm:$0xff]  ;;  %931 = vmatprep.subr.mxu0 %v230_v0  ;;  %v222_v3 = vld [vmem:[%s188_s30 + $0x8] sm:$0xff]  ;;  %s779_s27 = sshll.u32 %s218_s18, 4  ;;  %s1392_s29 = scalar_lea.hbm %s1441_s3, %s910_s20  ;;  %s1394_s27 = int_to_ptr.vmem [resolvable:$true] %s779_s27 }
  0x56   : > { %935 = vmatprep.mubr.msk.f32.mxu0 %vm231_vm0, %v221_v2  ;;  %932 = vmatpush3.msra.mxu0 %v230_v0  ;;  %v224_v5 = vld [vmem:[%s188_s30 + $0x18] sm:$0xff]  ;;  %v225_v6 = vld [vmem:[%s188_s30 + $0x20] sm:$0xff]  ;;  %v226_v7 = vld [vmem:[%s188_s30 + $0x28] sm:$0xff]  ;;  %s765_s16 = scalar_lea.sflag [#allocation4], %s1349_s5  ;;  %s1115_s4 = scalar_lea.vmem %s1394_s27, 1024 }
  0x57   : > { %933 = vmatprep.subr.mxu0 %v229_v1  ;;  %v227_v8 = vld [vmem:[%s188_s30 + $0x30] sm:$0xff]  ;;  %v228_v9 = vld [vmem:[%s188_s30 + $0x38] sm:$0xff]  ;;  %p1116_p5 = scmp.ne.s32.totalorder %s1394_s27, %s1115_s4  ;;  %p1456_p2 = scmp.ne.s32.totalorder %s1450_s10, 0 }
  0x58   : > { %934 = vmatpush3.msra.mxu0 %v229_v1  ;;  %v490_v10 = vld [vmem:[#allocation7 + $0x8] sm:$0xff]  ;;  %v489_v12 = vld [vmem:[#allocation7] sm:$0xff]  ;;  %s1190_s9 = smov [#allocation8]  }
  0x59   : > { %936 = vmatmul.mubr.msk.f32.vlgmr.msra.gmra.mxu0 %vm231_vm0, %v222_v3  ;;  %947 = vmatprep.subr.mxu1 %v490_v10  ;;  %p1117_p7 = pnand %p1116_p5, %p1456_p2  ;;  %s1119_s21 = sshll.u32 %s1190_s9, 4  ;;  %s1120_s21 = int_to_ptr.vmem [resolvable:$false] %s1119_s21 }
  0x5a   : > { %938 = vmatprep.mubr.msk.f32.mxu0 %vm231_vm0, %v223_v4  ;;  %948 = vmatpush3.msra.mxu1 %v490_v10  ;;  %s1121_s22 = scalar_lea.vmem %s1120_s21, 2048  ;;  %p1122_p13 = scmp.lt.s32.totalorder %s1394_s27, %s1120_s21 }
  0x5b   : > { %949 = vmatprep.subr.mxu1 %v489_v12  ;;  %p1118_p12 = pneg %p1117_p7  ;;  %p1123_p0 = scmp.lt.s32.totalorder %s1121_s22, %s1115_s4 }
  0x5c   : > { %950 = vmatpush3.msra.mxu1 %v489_v12 }
  0x5d   : > { %939 = vmatmul.mubr.msk.f32.gmra.mxu0 %vm231_vm0, %v224_v5  ;;  %p1124_p10 = por %p1123_p0, %p1122_p13 }
  0x5e   : > { %941 = vmatprep.mubr.msk.f32.mxu0 %vm231_vm0, %v225_v6 }
  0x5f   : > { %p1125_p3 = pnand %p1124_p10, %p1118_p12 }
  0x61   : > { %942 = vmatmul.mubr.msk.f32.gmra.mxu0 %vm231_vm0, %v226_v7 }
  0x62   : > { %944 = vmatprep.mubr.msk.f32.mxu0 %vm231_vm0, %v227_v8 }
  0x65   : > { %945 = vmatmul.mubr.msk.f32.gmra.mxu0 %vm231_vm0, %v228_v9 }
 0x119   : > { %v937_v11 = vpop.f32.mrf.mxu0 }
 0x11b   : > { %v322_v13 = vpop.f32.mrf.mxu0 }
 0x11c   : > { %361 = vxpose.xlu0.b32.start [1/2] (short) (narrow) %v322_v13, 16 }
 0x11d   : > { %v940_v14 = vpop.f32.mrf.mxu0 }
 0x11f   : > { %v332_v15 = vpop.f32.mrf.mxu0 }
 0x120   : > { %362 = vxpose.xlu0.b32.end [2/2] (short) (narrow) %v937_v11, 16  ;;  %393 = vxpose.xlu1.b32.start [1/2] (short) (narrow) %v332_v15, 16 }
 0x121   : > { %v943_v16 = vpop.f32.mrf.mxu0 }
 0x123   : > { %v342_v17 = vpop.f32.mrf.mxu0 }
 0x124   : > { %394 = vxpose.xlu1.b32.end [2/2] (short) (narrow) %v940_v14, 16  ;;  %425 = vxpose.xlu0.b32.start [1/2] (short) (narrow) %v342_v17, 16 }
 0x125   : > { %v946_v18 = vpop.f32.mrf.mxu0 }
 0x127   : > { %v352_v19 = vpop.f32.mrf.mxu0 }
 0x128   : > { %426 = vxpose.xlu0.b32.end [2/2] (short) (narrow) %v943_v16, 16  ;;  %457 = vxpose.xlu1.b32.start [1/2] (short) (narrow) %v352_v19, 16 }
 0x12c   : > { %458 = vxpose.xlu1.b32.end [2/2] (short) (narrow) %v946_v18, 16 }
 0x198   : > { %v377_v20 = vpop.trf.xlu0 }
 0x199   : > { %951 = vmatprep.mubr.msk.f32.mxu1 %vm231_vm0, %v377_v20 }
 0x19c   : > { %v378_v21 = vpop.trf.xlu0  ;;  %v409_v22 = vpop.trf.xlu1 }
 0x19d   : > { %952 = vmatmul.mubr.msk.f32.vlgmr.msra.gmra.mxu1 %vm231_vm0, %v378_v21 }
 0x19e   : > { %954 = vmatprep.mubr.msk.f32.mxu1 %vm231_vm0, %v409_v22 }
 0x1a0   : > { %v410_v23 = vpop.trf.xlu1  ;;  %v441_v24 = vpop.trf.xlu0 }
 0x1a1   : > { %955 = vmatmul.mubr.msk.f32.gmra.mxu1 %vm231_vm0, %v410_v23 }
 0x1a2   : > { %957 = vmatprep.mubr.msk.f32.mxu1 %vm231_vm0, %v441_v24 }
 0x1a4   : > { %v442_v25 = vpop.trf.xlu0  ;;  %v473_v26 = vpop.trf.xlu1 }
 0x1a5   : > { %958 = vmatmul.mubr.msk.f32.gmra.mxu1 %vm231_vm0, %v442_v25 }
 0x1a6   : > { %960 = vmatprep.mubr.msk.f32.mxu1 %vm231_vm0, %v473_v26 }
 0x1a8   : > { %v474_v27 = vpop.trf.xlu1 }
 0x1a9   : > { %961 = vmatmul.mubr.msk.f32.gmra.mxu1 %vm231_vm0, %v474_v27 }
 0x25d   : > { %v953_v28 = vpop.f32.mrf.mxu1 }
 0x25f   : > { %v581_v29 = vpop.f32.mrf.mxu1 }
 0x260   : > { %620 = vxpose.xlu0.b32.start [1/2] (short) (narrow) %v581_v29, 16 }
 0x261   : > { %v956_v30 = vpop.f32.mrf.mxu1 }
 0x263   : > { %v591_v31 = vpop.f32.mrf.mxu1 }
 0x264   : > { %621 = vxpose.xlu0.b32.end [2/2] (short) (narrow) %v953_v28, 16  ;;  %652 = vxpose.xlu1.b32.start [1/2] (short) (narrow) %v591_v31, 16 }
 0x265   : > { %v959_v32 = vpop.f32.mrf.mxu1 }
 0x267   : > { %v601_v33 = vpop.f32.mrf.mxu1 }
 0x268   : > { %684 = vxpose.xlu0.b32.start [1/2] (short) (narrow) %v601_v33, 16  ;;  %653 = vxpose.xlu1.b32.end [2/2] (short) (narrow) %v956_v30, 16 }
 0x269   : > { %v962_v34 = vpop.f32.mrf.mxu1 }
 0x26b   : > { %v611_v35 = vpop.f32.mrf.mxu1 }
 0x26c   : > { %685 = vxpose.xlu0.b32.end [2/2] (short) (narrow) %v959_v32, 16  ;;  %716 = vxpose.xlu1.b32.start [1/2] (short) (narrow) %v611_v35, 16 }
 0x270   : > { %717 = vxpose.xlu1.b32.end [2/2] (short) (narrow) %v962_v34, 16 }
 0x2dc   : > { %v636_v36 = vpop.trf.xlu0 }
 0x2dd   : > { %v748_v37 = vmul.f32 0.04, %v636_v36 }
 0x2df   : > { %756 = vst.msk [vmem:[%s218_s18] sm:$0xff] %vm231_vm0, %v748_v37 }
 0x2e0   : > { %v668_v38 = vpop.trf.xlu1  ;;  %v637_v39 = vpop.trf.xlu0 }
 0x2e1   : > { %v750_v40 = vmul.f32 0.04, %v668_v38  ;;  %v749_v41 = vmul.f32 0.04, %v637_v39 }
 0x2e3   : > { %758 = vst.msk [vmem:[%s218_s18 + $0x10] sm:$0xff] %vm231_vm0, %v750_v40  ;;  %757 = vst.msk [vmem:[%s218_s18 + $0x8] sm:$0xff] %vm231_vm0, %v749_v41 }
 0x2e4   : > { %v669_v42 = vpop.trf.xlu1  ;;  %v700_v43 = vpop.trf.xlu0 }
 0x2e5   : > { %v751_v44 = vmul.f32 0.04, %v669_v42  ;;  %v752_v45 = vmul.f32 0.04, %v700_v43 }
 0x2e7   : > { %759 = vst.msk [vmem:[%s218_s18 + $0x18] sm:$0xff] %vm231_vm0, %v751_v44  ;;  %760 = vst.msk [vmem:[%s218_s18 + $0x20] sm:$0xff] %vm231_vm0, %v752_v45 }
 0x2e8   : > { %v732_v46 = vpop.trf.xlu1  ;;  %v701_v47 = vpop.trf.xlu0 }
 0x2e9   : > { %v754_v48 = vmul.f32 0.04, %v732_v46  ;;  %v753_v49 = vmul.f32 0.04, %v701_v47 }
 0x2eb   : > { %762 = vst.msk [vmem:[%s218_s18 + $0x30] sm:$0xff] %vm231_vm0, %v754_v48  ;;  %761 = vst.msk [vmem:[%s218_s18 + $0x28] sm:$0xff] %vm231_vm0, %v753_v49 }
 0x2ec   : > { %v733_v50 = vpop.trf.xlu1 }
 0x2ed   : > { %v755_v51 = vmul.f32 0.04, %v733_v50 }
 0x2ef   : > { %763 = vst.msk [vmem:[%s218_s18 + $0x38] sm:$0xff] %vm231_vm0, %v755_v51 }
 0x2f0   : > { %1128 = shalt.err (!%p1125_p3)
}
 0x2f1   : > { %s1129_s17 = scalar_lea.hbm %s1392_s29, 1024  ;;  %s1133_s26 = scalar_lea.hbm %s1441_s3, 2048 }
 0x2f2   : > { %p1130_p11 = scmp.ne.s32.totalorder %s1392_s29, %s1129_s17  ;;  %p1134_p4 = scmp.lt.s32.totalorder %s1392_s29, %s1441_s3 }
 0x2f3   : > { %p1135_p6 = scmp.lt.s32.totalorder %s1133_s26, %s1129_s17 }
 0x2f4   : > { %p1131_p9 = pnand %p1130_p11, %p1456_p2 }
 0x2f5   : > { %p1136_p8 = por %p1135_p6, %p1134_p4 }
 0x2f6   : > { %p1132_p1 = pneg %p1131_p9 }
 0x2f8   : > { %p1137_p5 = pnand %p1136_p8, %p1132_p1 }
 0x2fa   : > { %1140 = shalt.err (!%p1137_p5)
}
 0x2fb   : > { %s1191_s30 = smov 128   ;;  %s1192_s18 = smov 8  }
 0x2fc   : > { %973 = dma.vmem_to_hbm [thread:$0]  (%p1456_p2), %s1394_s27, 1024, %s1392_s29, %s765_s16, %s1191_s30, %s1191_s30, %s1192_s18  }
 0x2fd PF: > { %s794_s20 = sand.u32 1, %s1171_s12   ;;  %p1457_p7 = scmp.ne.s32.totalorder %s1447_s19, 0 }
 0x2fe   : > { %p1458_p12 = scmp.ge.s32.totalorder %s1183_s15, 2  ;;  %s795_s28 = scalar_lea.sflag [#allocation4], %s794_s20 }
 0x300   : > { %p987_p13 = pnand %p1458_p12, %p1457_p7 }
 0x302   : > { %p988_p0 = pneg %p987_p13 }
 0x304   : > { %1166 = dma.done.wait (%p988_p0), %s795_s28, 1024  }
 0x305   : > { %1168 = vsyncadd (%p988_p0), %s795_s28, 4294966272  ;;  %p17_p10 = scmp.ge.s32.totalorder %s1291_s7, 4   ;;  %s1459_s12 = smov %s1175_s13 }
 0x306   : > { %s1460_s13 = smov %s1179_s14  ;;  %s1461_s14 = smov %s1307_s11 }
 0x307   : > { %s1462_s15 = smov %s1291_s7  ;;  %19 = sbr.rel (!%p17_p10) target bundleno = 6 (0x6), region = 85 }
 0x30c   :  { %800 = vsyncpa [#allocation3], 1 }
 0x30d   :  { %802 = vsyncpa [#allocation3 + $0x1], 1 }
 0x30e   :  { %803 = vsyncpa [#allocation6], 1 }
 0x30f   :  { %804 = vsyncpa [#allocation4], 1 }
 0x310   :  { %806 = vsyncpa [#allocation4 + $0x1], 1 }

</bundles_post_ra>
